<compile_context>
chip_gen: v5e
topology: v5e:2x2
jax: 0.10.0
libtpu: 0.0.40
codegen_flags: <defaults>
</compile_context>

<pallas_src>
import jax
import jax.numpy as jnp
from jax import lax
from jax.experimental import pallas as pl
from jax.experimental.pallas import tpu as pltpu

LANE = 128
SUBLANE = 8


def _round_up(v, m):
    return (v + m - 1) // m * m


# ----------------------------------------------------------------------------
# Fused Pallas kernel: grid axis = layer index, activation kept in VMEM scratch
# ----------------------------------------------------------------------------
def fused_gcn_kernel(a_ref, x_ref, w_ref, b_ref, o_ref, h_ref):
    l = pl.program_id(0)
    last = pl.num_programs(0) - 1

    # Layer 0: seed the resident activation with the (padded) node features.
    @pl.when(l == 0)
    def _():
        h_ref[...] = x_ref[...]

    a = a_ref[...]                                  # (Np, Np)  bf16, fetched once
    h = h_ref[...].astype(jnp.bfloat16)             # (Np, 128) bf16 MXU operand

    # Aggregation over source nodes, f32 accumulation on the MXU.
    agg = jnp.dot(a, h, preferred_element_type=jnp.float32)          # (Np, 128) f32
    # Feature transform + bias (padded 128x128 weight; zero cols keep padding clean).
    out = jnp.dot(agg.astype(jnp.bfloat16), w_ref[...],
                  preferred_element_type=jnp.float32) + b_ref[...]   # (Np, 128) f32

    # Hidden layers: ReLU (Dropout in eval mode is the identity), stay in VMEM.
    @pl.when(l != last)
    def _():
        h_ref[...] = jnp.maximum(out, 0.0)

    # Final layer: lane-dense (Np, 128) store; true columns sliced in the wrapper.
    @pl.when(l == last)
    def _():
        o_ref[...] = out.astype(o_ref.dtype)


def fused_gcn(a_hat_bf16, x_pad, w_stack, b_stack):
    n_pad = x_pad.shape[0]
    num_layers, f_pad, _ = w_stack.shape
    return pl.pallas_call(
        fused_gcn_kernel,
        out_shape=jax.ShapeDtypeStruct((n_pad, f_pad), jnp.float32),
        grid_spec=pltpu.PrefetchScalarGridSpec(
            num_scalar_prefetch=0,
            grid=(num_layers,),
            in_specs=[
                # Constant index maps -> A_hat and X are DMA'd into VMEM once.
                pl.BlockSpec((n_pad, n_pad), lambda l: (0, 0)),
                pl.BlockSpec((n_pad, f_pad), lambda l: (0, 0)),
                # Per-layer weight / bias streamed along the layer grid axis.
                pl.BlockSpec((None, f_pad, f_pad), lambda l: (l, 0, 0)),
                pl.BlockSpec((None, 1, f_pad), lambda l: (l, 0, 0)),
            ],
            out_specs=pl.BlockSpec((n_pad, f_pad), lambda l: (0, 0)),
            scratch_shapes=[pltpu.VMEM((n_pad, f_pad), jnp.float32)],
        ),
        compiler_params=pltpu.CompilerParams(
            # Layers are sequentially dependent through the VMEM activation.
            dimension_semantics=("arbitrary",),
        ),
    )(a_hat_bf16, x_pad, w_stack, b_stack)


# ----------------------------------------------------------------------------
# Plain-JAX glue: dense symmetric GCN normalization (PyG gcn_norm equivalent)
# ----------------------------------------------------------------------------
def gcn_norm_dense(edge_index, edge_weight, num_nodes):
    src = edge_index[0]
    dst = edge_index[1]
    adj = jnp.zeros((num_nodes, num_nodes), jnp.float32)
    adj = adj.at[dst, src].add(edge_weight.astype(jnp.float32))
    # add self loops with weight 1.0 (inputs contain no pre-existing self loops)
    adj = adj + jnp.eye(num_nodes, dtype=jnp.float32)
    deg = adj.sum(axis=1)
    dinv = jnp.where(deg > 0.0, lax.rsqrt(deg), 0.0)
    return dinv[:, None] * adj * dinv[None, :]


# ----------------------------------------------------------------------------
# Model: parameter construction + forward
# ----------------------------------------------------------------------------
def init_gnn_params(key, c_in, c_hidden, c_out, num_layers):
    """Glorot-uniform weights, zero bias -- matches GCNConv init shapes."""
    dims = [c_in] + [c_hidden] * (num_layers - 1) + [c_out]
    params = []
    for l in range(num_layers):
        key, wk = jax.random.split(key)
        fan_in, fan_out = dims[l], dims[l + 1]
        limit = jnp.sqrt(6.0 / (fan_in + fan_out))
        w = jax.random.uniform(
            wk, (fan_in, fan_out), jnp.float32, minval=-limit, maxval=limit
        )
        b = jnp.zeros((1, fan_out), jnp.float32)
        params.append((w, b))
    return params


def pack_params(params, f_pad):
    """Zero-pad every (W_l, b_l) to (f_pad, f_pad)/(1, f_pad) and stack on layer axis."""
    num_layers = len(params)
    w_stack = jnp.zeros((num_layers, f_pad, f_pad), jnp.float32)
    b_stack = jnp.zeros((num_layers, 1, f_pad), jnp.float32)
    for l, (w, b) in enumerate(params):
        w_stack = w_stack.at[l, : w.shape[0], : w.shape[1]].set(w)
        b_stack = b_stack.at[l, :, : b.shape[1]].set(b)
    return w_stack.astype(jnp.bfloat16), b_stack


def gnn_forward(params, x, edge_index, edge_weight):
    n = x.shape[0]
    c_out = params[-1][0].shape[1]
    dims = [params[0][0].shape[0]] + [w.shape[1] for w, _ in params]
    n_pad = _round_up(n, SUBLANE)
    f_pad = _round_up(max(max(dims), LANE), LANE)

    a_hat = gcn_norm_dense(edge_index, edge_weight, n)
    a_pad = jnp.zeros((n_pad, n_pad), jnp.float32).at[:n, :n].set(a_hat)
    a_bf16 = a_pad.astype(jnp.bfloat16)          # halves HBM bytes of the N x N operand

    x_pad = (
        jnp.zeros((n_pad, f_pad), jnp.float32)
        .at[:n, : x.shape[1]]
        .set(x.astype(jnp.float32))
    )

    w_stack, b_stack = pack_params(params, f_pad)

    out_pad = fused_gcn(a_bf16, x_pad, w_stack, b_stack)
    return out_pad[:n, :c_out]


# ----------------------------------------------------------------------------
# Main
# ----------------------------------------------------------------------------
if __name__ == "__main__":
    config = {
        "c_in": 16,
        "c_hidden": 32,
        "c_out": 8,
        "num_layers": 3,
        "layer_name": "GCN",
        "dp_rate": 0.1,
    }
    num_nodes = 64
    num_edges = 256

    key = jax.random.PRNGKey(0)
    k_x, k_src, k_dst, k_w, k_params = jax.random.split(key, 5)

    x = jax.random.normal(k_x, (num_nodes, config["c_in"]), jnp.float32)

    src = jax.random.randint(k_src, (num_edges,), 0, num_nodes, jnp.int32)
    dst = jax.random.randint(k_dst, (num_edges,), 0, num_nodes, jnp.int32)
    # avoid pre-existing self loops so A + I matches add_remaining_self_loops
    dst = jnp.where(dst == src, (dst + 1) % num_nodes, dst)
    edge_index = jnp.stack([src, dst], axis=0)
    edge_weight = jax.random.uniform(
        k_w, (num_edges,), jnp.float32, minval=0.1, maxval=1.0
    )

    params = init_gnn_params(
        k_params,
        config["c_in"],
        config["c_hidden"],
        config["c_out"],
        config["num_layers"],
    )

    out = gnn_forward(params, x, edge_index, edge_weight)
    out = jax.block_until_ready(out)
    assert out.shape == (num_nodes, config["c_out"])
    print("KERNEL_OK")
</pallas_src>

<mosaic_0001>
module attributes {stable_mosaic.version = 11 : i64} {
  func.func @fused_gcn_kernel(%arg0: i32, %arg1: memref<64x64xbf16, #tpu.memory_space<vmem>>, %arg2: memref<64x128xf32, #tpu.memory_space<vmem>>, %arg3: memref<1x128x128xbf16, #tpu.memory_space<vmem>>, %arg4: memref<1x1x128xf32, #tpu.memory_space<vmem>>, %arg5: memref<64x128xf32, #tpu.memory_space<vmem>>, %arg6: memref<64x128xf32, #tpu.memory_space<vmem>>) attributes {dimension_semantics = [#tpu.dimension_semantics<arbitrary>], iteration_bounds = array<i64: 3>, scalar_prefetch = 0 : i64, scratch_operands = 1 : i64, tpu.core_type = #tpu.core_type<tc>, window_params = [{pipeline_mode = #tpu.pipeline_mode<synchronous>, transform_indices = @transform_0, window_bounds = array<i64: 64, 64>}, {pipeline_mode = #tpu.pipeline_mode<synchronous>, transform_indices = @transform_1, window_bounds = array<i64: 64, 128>}, {transform_indices = @transform_2, window_bounds = array<i64: 1, 128, 128>}, {transform_indices = @transform_3, window_bounds = array<i64: 1, 1, 128>}, {pipeline_mode = #tpu.pipeline_mode<synchronous>, transform_indices = @transform_4, window_bounds = array<i64: 64, 128>}]} {
    %c0_i32 = arith.constant 0 : i32
    %0 = arith.cmpi eq, %arg0, %c0_i32 : i32
    %1 = arith.extui %0 : i1 to i32
    %c0_i32_0 = arith.constant 0 : i32
    %2 = arith.cmpi ne, %1, %c0_i32_0 : i32
    scf.if %2 {
      %c0_14 = arith.constant 0 : index
      %c0_15 = arith.constant 0 : index
      %21 = vector.load %arg2[%c0_14, %c0_15] : memref<64x128xf32, #tpu.memory_space<vmem>>, vector<64x128xf32>
      %c0_16 = arith.constant 0 : index
      %c0_17 = arith.constant 0 : index
      %22 = vector.load %arg6[%c0_16, %c0_17] : memref<64x128xf32, #tpu.memory_space<vmem>>, vector<64x128xf32>
      tpu.vector_store %arg6[%c0_16, %c0_17], %21 {strides = array<i32>} : memref<64x128xf32, #tpu.memory_space<vmem>>, vector<64x128xf32>,
    } else {
    }
    %c0 = arith.constant 0 : index
    %c0_1 = arith.constant 0 : index
    %3 = vector.load %arg1[%c0, %c0_1] : memref<64x64xbf16, #tpu.memory_space<vmem>>, vector<64x64xbf16>
    %c0_2 = arith.constant 0 : index
    %c0_3 = arith.constant 0 : index
    %4 = vector.load %arg6[%c0_2, %c0_3] : memref<64x128xf32, #tpu.memory_space<vmem>>, vector<64x128xf32>
    %5 = arith.truncf %4 : vector<64x128xf32> to vector<64x128xbf16>
    %cst = arith.constant dense<0.000000e+00> : vector<64x128xf32>
    %6 = tpu.matmul %3, %5, %cst {dimension_numbers = #tpu.dot_dimension_numbers<[1], [0], [0], [1], [0, 0, 1, 1], [], []>} : vector<64x64xbf16>, vector<64x128xbf16>, vector<64x128xf32> -> vector<64x128xf32>
    %7 = arith.truncf %6 : vector<64x128xf32> to vector<64x128xbf16>
    %c0_4 = arith.constant 0 : index
    %c0_5 = arith.constant 0 : index
    %c0_6 = arith.constant 0 : index
    %8 = vector.load %arg3[%c0_4, %c0_5, %c0_6] : memref<1x128x128xbf16, #tpu.memory_space<vmem>>, vector<1x128x128xbf16>
    %9 = vector.shape_cast %8 : vector<1x128x128xbf16> to vector<128x128xbf16>
    %cst_7 = arith.constant dense<0.000000e+00> : vector<64x128xf32>
    %10 = tpu.matmul %7, %9, %cst_7 {dimension_numbers = #tpu.dot_dimension_numbers<[1], [0], [0], [1], [0, 0, 1, 1], [], []>} : vector<64x128xbf16>, vector<128x128xbf16>, vector<64x128xf32> -> vector<64x128xf32>
    %c0_8 = arith.constant 0 : index
    %c0_9 = arith.constant 0 : index
    %c0_10 = arith.constant 0 : index
    %11 = vector.load %arg4[%c0_8, %c0_9, %c0_10] : memref<1x1x128xf32, #tpu.memory_space<vmem>>, vector<1x1x128xf32>
    %12 = vector.shape_cast %11 : vector<1x1x128xf32> to vector<1x128xf32>
    %13 = vector.broadcast %12 : vector<1x128xf32> to vector<64x128xf32>
    %14 = arith.addf %10, %13 : vector<64x128xf32>
    %c2_i32 = arith.constant 2 : i32
    %15 = arith.cmpi ne, %arg0, %c2_i32 : i32
    %16 = arith.extui %15 : i1 to i32
    %c0_i32_11 = arith.constant 0 : i32
    %17 = arith.cmpi ne, %16, %c0_i32_11 : i32
    scf.if %17 {
      %cst_14 = arith.constant 0.000000e+00 : f32
      %21 = vector.broadcast %cst_14 : f32 to vector<64x128xf32>
      %22 = arith.maximumf %14, %21 : vector<64x128xf32>
      %c0_15 = arith.constant 0 : index
      %c0_16 = arith.constant 0 : index
      %23 = vector.load %arg6[%c0_15, %c0_16] : memref<64x128xf32, #tpu.memory_space<vmem>>, vector<64x128xf32>
      tpu.vector_store %arg6[%c0_15, %c0_16], %22 {strides = array<i32>} : memref<64x128xf32, #tpu.memory_space<vmem>>, vector<64x128xf32>,
    } else {
    }
    %c2_i32_12 = arith.constant 2 : i32
    %18 = arith.cmpi eq, %arg0, %c2_i32_12 : i32
    %19 = arith.extui %18 : i1 to i32
    %c0_i32_13 = arith.constant 0 : i32
    %20 = arith.cmpi ne, %19, %c0_i32_13 : i32
    scf.if %20 {
      %c0_14 = arith.constant 0 : index
      %c0_15 = arith.constant 0 : index
      %21 = vector.load %arg5[%c0_14, %c0_15] : memref<64x128xf32, #tpu.memory_space<vmem>>, vector<64x128xf32>
      tpu.vector_store %arg5[%c0_14, %c0_15], %14 {strides = array<i32>} : memref<64x128xf32, #tpu.memory_space<vmem>>, vector<64x128xf32>,
    } else {
    }
    return
  }
  func.func @transform_0(%arg0: i32) -> (i32, i32) {
    %c0_i32 = arith.constant 0 : i32
    %c0_i32_0 = arith.constant 0 : i32
    %c0_i32_1 = arith.constant 0 : i32
    return %c0_i32, %c0_i32_0 : i32, i32
  }
  func.func @transform_1(%arg0: i32) -> (i32, i32) {
    %c0_i32 = arith.constant 0 : i32
    %c0_i32_0 = arith.constant 0 : i32
    %c0_i32_1 = arith.constant 0 : i32
    return %c0_i32, %c0_i32_0 : i32, i32
  }
  func.func @transform_2(%arg0: i32) -> (i32, i32, i32) {
    %c0_i32 = arith.constant 0 : i32
    %c0_i32_0 = arith.constant 0 : i32
    %c0_i32_1 = arith.constant 0 : i32
    return %arg0, %c0_i32, %c0_i32_0 : i32, i32, i32
  }
  func.func @transform_3(%arg0: i32) -> (i32, i32, i32) {
    %c0_i32 = arith.constant 0 : i32
    %c0_i32_0 = arith.constant 0 : i32
    %c0_i32_1 = arith.constant 0 : i32
    return %arg0, %c0_i32, %c0_i32_0 : i32, i32, i32
  }
  func.func @transform_4(%arg0: i32) -> (i32, i32) {
    %c0_i32 = arith.constant 0 : i32
    %c0_i32_0 = arith.constant 0 : i32
    %c0_i32_1 = arith.constant 0 : i32
    return %c0_i32, %c0_i32_0 : i32, i32
  }
}

</mosaic_0001>

<bundles_post_ra>
// kernel: tpu_custom_call.1
= control target key start
LH: loop header
LB: loop body
LE: loop exit
PB: predicated region body
PF: predicated region fallthrough
CT: control target
= control target key end

     0   :  { %s1188_s0 = inlined_call_operand.hbm [shape: bf16[64,64], index: 0, kind: input, shape index: {}]   ;;  %s1189_s1 = inlined_call_operand.hbm [shape: f32[64,128], index: 1, kind: input, shape index: {}]   ;;  %s1190_s2 = inlined_call_operand.hbm [shape: bf16[3,128,128], index: 2, kind: input, shape index: {}]   ;;  %s1191_s3 = inlined_call_operand.hbm [shape: f32[3,1,128], index: 3, kind: input, shape index: {}]   ;;  %s1192_s4 = inlined_call_operand.hbm [shape: f32[64,128], index: 4, kind: output, shape index: {}]  }
   0x1   :  { %1194 = sst [smem:[#allocation15_spill]] %s1188_s0 }
   0x2   :  { %1195 = sst [smem:[#allocation16_spill]] %s1189_s1 }
   0x3   :  { %9 = vsyncpa [#allocation4], 0 }
   0x4   :  { %10 = vsyncpa [#allocation7], 0 }
   0x5   :  { %11 = vsyncpa [#allocation5], 0  ;;  %s1006_s15 = smov 0   ;;  %s1008_s16 = smov 0  }
   0x6   :  { %s1010_s17 = smov 0   ;;  %s1012_s18 = smov 0  }
   0x7 LB: > { %s1025_s19 = sadd.s32 4294967295, %s970_s18   ;;  %p79_p0 = scmp.ne.s32.totalorder %s962_s16, %s958_s15  ;;  %s970_s18 = sphi %s1012_s18, %s1206_s18   ;;  %s966_s17 = sphi %s1010_s17, %s1205_s17   ;;  %s962_s16 = sphi %s1008_s16, %s1204_s16   ;;  %s958_s15 = sphi %s1006_s15, %s1203_s15  }
   0x8   : > { %p80_p1 = scmp.eq.s32.totalorder %s1025_s19, 0  ;;  %p602_p2 = scmp.ge.s32.totalorder %s970_s18, 1 }
   0x9   : > { %p137_p3 = scmp.lt.s32.totalorder %s970_s18, 4  ;;  %p603_p4 = scmp.ne.s32.totalorder %s1025_s19, 0 }
   0xa   : > { %p1034_p5 = por %p80_p1, %p79_p0  ;;  %s1197_s0 = sld [smem:[#allocation15_spill]] }
   0xb   : > { %p1041_p6 = pnand %p602_p2, %p137_p3  ;;  %s972_s25 = smov [#allocation3]  }
   0xc   : > { %s150_s26 = sshll.u32 %s972_s25, 4  ;;  %s1054_s28 = sadd.s32 1, %s970_s18   ;;  %s151_s26 = int_to_ptr.vmem [resolvable:$true] %s150_s26 }
   0xd   : > { %p713_p7 = pneg %p1041_p6  ;;  %s973_s29 = smov 64  }
   0xe   : > { %s974_s30 = smov 4   ;;  %s63_s5 = ssub.s32 %s970_s18, %s1054_s28 }
   0xf   : > { %p1049_p8 = pnand %p713_p7, %p80_p1  ;;  %s66_s6 = sadd.s32 1, %s966_s17 }
  0x10   : > { %s148_s23 = sshll.u32 %s1197_s0, 4  ;;  %p64_p9 = scmp.eq.s32.totalorder %s63_s5, 0  ;;  %s149_s23 = int_to_ptr.hbm [resolvable:$true] %s148_s23 }
  0x11   : > { %716 = dma.hbm_to_vmem [thread:$0]  (!%p1049_p8), %s149_s23, 512, %s151_s26, [#allocation4], %s973_s29, %s973_s29, %s974_s30  }
  0x12   : > { %p73_p10 = scmp.ne.s32.totalorder %s966_s17, %s962_s16  ;;  %p74_p11 = scmp.eq.s32.totalorder %s970_s18, 0 }
  0x13   : > { %p729_p12 = scmp.lt.s32.totalorder %s970_s18, 3  ;;  %s178_s8 = sand.u32 1, %s970_s18  }
  0x14   : > { %s1069_s7 = scalar_select %p64_p9, %s966_s17, %s66_s6  }
  0x15   : > { %p75_p13 = por %p74_p11, %p73_p10  ;;  %s1193_s9 = sand.u32 1, %s966_s17  }
  0x16   : > { %s606_s10 = sshll.u32 %s1193_s9, 6  ;;  %s672_s11 = sshll.u32 %s970_s18, 6 }
  0x17   : > { %s187_s14 = scalar_lea.hbm %s1190_s2, %s672_s11  ;;  %s182_s21 = scalar_lea.vmem [#allocation8], %s606_s10 }
  0x18   : > { %s188_s15 = sshll.u32 %s187_s14, 4  ;;  %s190_s22 = sshll.u32 %s182_s21, 4  ;;  %s189_s15 = int_to_ptr.hbm [resolvable:$true] %s188_s15  ;;  %s191_s22 = int_to_ptr.vmem [resolvable:$true] %s190_s22 }
  0x19   : > { %p1081_p0 = pnand %p729_p12, %p75_p13  ;;  %s1201_s1 = sld [smem:[#allocation16_spill]] }
  0x1a   : > { %s975_s6 = smov [#allocation6]   ;;  %s1088_s11 = scalar_lea.sflag [#allocation4], %s178_s8 }
  0x1b   : > { %s164_s12 = sshll.u32 %s975_s6, 4  ;;  %s806_s10 = sshra.s32 %s189_s15, 4  ;;  %s807_s10 = int_to_ptr.hbm [resolvable:$true] %s806_s10  ;;  %s165_s12 = int_to_ptr.vmem [resolvable:$true] %s164_s12 }
  0x1c   : > { %s808_s13 = scalar_lea.hbm %s807_s10, 64  ;;  %p810_p3 = pneg %p1081_p0 }
  0x1d   : > { %p809_p2 = scmp.ne.s32.totalorder %s807_s10, %s808_s13  ;;  %s813_s25 = scalar_lea.hbm %s1190_s2, 192 }
  0x1e   : > { %p814_p10 = scmp.lt.s32.totalorder %s807_s10, %s1190_s2  ;;  %p815_p11 = scmp.lt.s32.totalorder %s813_s25, %s808_s13 }
  0x1f   : > { %s162_s5 = sshll.u32 %s1201_s1, 4  ;;  %p811_p7 = pnand %p810_p3, %p809_p2  ;;  %s163_s5 = int_to_ptr.hbm [resolvable:$true] %s162_s5 }
  0x20   : > { %p816_p12 = por %p815_p11, %p814_p10 }
  0x21   : > { %p812_p9 = pneg %p811_p7 }
  0x23   : > { %p817_p13 = pnand %p816_p12, %p812_p9 }
  0x25   : > { %820 = shalt.err (!%p817_p13)
}
  0x26   : > { %723 = dma.hbm_to_vmem [thread:$0]  (!%p1081_p0), %s189_s15, 1024, %s191_s22, %s1088_s11, %s973_s29, %s973_s29, %s974_s30  }
  0x27   : > { %s976_s8 = smov 128   ;;  %s977_s6 = smov 8  }
  0x28   : > { %719 = dma.hbm_to_vmem [thread:$0]  (!%p1049_p8), %s163_s5, 1024, %s165_s12, [#allocation7], %s976_s8, %s976_s8, %s977_s6  }
  0x29   : > { %s206_s13 = scalar_lea.hbm %s1191_s3, %s970_s18  ;;  %s1202_s14 = sand.u32 1, %s966_s17  }
  0x2a   : > { %s203_s21 = scalar_lea.vmem [#allocation9], %s1202_s14  ;;  %s208_s26 = sshll.u32 %s206_s13, 4  ;;  %s209_s26 = int_to_ptr.hbm [resolvable:$true] %s208_s26 }
  0x2b   : > { %s210_s25 = sshll.u32 %s203_s21, 4  ;;  %s866_s0 = sshra.s32 %s209_s26, 4  ;;  %s211_s25 = int_to_ptr.vmem [resolvable:$true] %s210_s25  ;;  %s867_s0 = int_to_ptr.hbm [resolvable:$true] %s866_s0 }
  0x2c   : > { %s868_s1 = scalar_lea.hbm %s867_s0, 1  ;;  %s873_s30 = scalar_lea.hbm %s1191_s3, 3 }
  0x2d   : > { %p869_p2 = scmp.ne.s32.totalorder %s867_s0, %s868_s1  ;;  %p874_p8 = scmp.lt.s32.totalorder %s867_s0, %s1191_s3 }
  0x2e   : > { %p875_p10 = scmp.lt.s32.totalorder %s873_s30, %s868_s1 }
  0x2f   : > { %p871_p7 = pnand %p869_p2, %p810_p3 }
  0x30   : > { %p876_p11 = por %p875_p10, %p874_p8 }
  0x31   : > { %p872_p9 = pneg %p871_p7 }
  0x33   : > { %p877_p12 = pnand %p876_p11, %p872_p9 }
  0x35   : > { %880 = shalt.err (!%p877_p12)
}
  0x36   : > { %726 = dma.hbm_to_vmem [thread:$0]  (!%p1081_p0), %s209_s26, 16, %s211_s25, %s1088_s11  }
  0x37   : > { %219 = sbr.rel (%p1041_p6) target bundleno = 451 (0x1c3), region = 36 }
  0x3c   : > { %941 = dma.done.wait (%p80_p1), [#allocation4], 512  }
  0x3d   : > { %943 = vsyncadd (%p80_p1), [#allocation4], 4294966784 }
  0x3e   : > { %945 = dma.done.wait (%p80_p1), [#allocation7], 1024  }
  0x3f   : > { %947 = vsyncadd (%p80_p1), [#allocation7], 4294966272  ;;  %s231_s0 = sand.u32 1, %s1025_s19   ;;  %s233_s1 = sand.u32 1, %s962_s16  }
  0x40   : > { %s612_s22 = sshll.u32 %s233_s1, 6  ;;  %s232_s24 = scalar_lea.sflag [#allocation4], %s231_s0 }
  0x41   : > { %s1139_s23 = scalar_lea.vmem [#allocation8], %s612_s22 }
  0x42   : > { %949 = dma.done.wait (%p1034_p5), %s232_s24, 1040  }
  0x43   : > { %951 = vsyncadd (%p1034_p5), %s232_s24, 4294966256  ;;  %s1145_s5 = scalar_lea.vmem [#allocation9], %s233_s1  ;;  %273 = sbr.rel (%p603_p4) target bundleno = 81 (0x51), region = 56 }
  0x48   : > { %v274_v0 = vld [vmem:[#allocation6] sm:$0xff]  ;;  %v275_v1 = vld [vmem:[#allocation6 + $0x8] sm:$0xff]  ;;  %v276_v2 = vld [vmem:[#allocation6 + $0x10] sm:$0xff] }
  0x49   : > { %282 = vst [vmem:[#allocation2 + $0x30] sm:$0xff] %v274_v0  ;;  %v277_v3 = vld [vmem:[#allocation6 + $0x18] sm:$0xff]  ;;  %v278_v4 = vld [vmem:[#allocation6 + $0x20] sm:$0xff]  ;;  %v279_v5 = vld [vmem:[#allocation6 + $0x28] sm:$0xff] }
  0x4a   : > { %283 = vst [vmem:[#allocation2] sm:$0xff] %v275_v1  ;;  %v280_v6 = vld [vmem:[#allocation6 + $0x30] sm:$0xff]  ;;  %v281_v7 = vld [vmem:[#allocation6 + $0x38] sm:$0xff] }
  0x4b   : > { %284 = vst [vmem:[#allocation2 + $0x18] sm:$0xff] %v276_v2 }
  0x4c   : > { %285 = vst [vmem:[#allocation2 + $0x10] sm:$0xff] %v277_v3 }
  0x4d   : > { %286 = vst [vmem:[#allocation2 + $0x8] sm:$0xff] %v278_v4 }
  0x4e   : > { %287 = vst [vmem:[#allocation2 + $0x20] sm:$0xff] %v279_v5 }
  0x4f   : > { %288 = vst [vmem:[#allocation2 + $0x28] sm:$0xff] %v280_v6 }
  0x50   : > { %289 = vst [vmem:[#allocation2 + $0x38] sm:$0xff] %v281_v7 }
  0x51 PF: > { %v298_v17 = vld [vmem:[#allocation2 + $0x30] sm:$0xff]  ;;  %v299_v18 = vld [vmem:[#allocation2] sm:$0xff]  ;;  %v674_v21 = vld [vmem:[#allocation3 + $0x8] sm:$0xff]  ;;  %vm330_vm0 = vcmask 523264   ;;  %p666_p1 = scmp.eq.s32.totalorder %s1025_s19, 2 }
  0x52   : > { %v300_v14 = vld [vmem:[#allocation2 + $0x18] sm:$0xff]  ;;  %v306_v19 = vpack.c.bf16 %v299_v18, %v298_v17  ;;  %v673_v20 = vld [vmem:[#allocation3] sm:$0xff]  ;;  %v683_v23 = vld [vmem:[%s1139_s23 + $0x30] sm:$0xff] }
  0x53   : > { %v301_v15 = vld [vmem:[#allocation2 + $0x10] sm:$0xff]  ;;  %v684_v22 = vld [vmem:[%s1139_s23 + $0x38] sm:$0xff]  ;;  %v682_v24 = vld [vmem:[%s1139_s23 + $0x28] sm:$0xff] }
  0x54   : > { %v302_v10 = vld [vmem:[#allocation2 + $0x8] sm:$0xff]  ;;  %v307_v16 = vpack.c.bf16 %v301_v15, %v300_v14  ;;  %444 = vmatpush.bf16.msra.mxu1 %v684_v22  ;;  %689 = vmatpush.bf16.msra.mxu2 %v684_v22  ;;  %v681_v25 = vld [vmem:[%s1139_s23 + $0x20] sm:$0xff]  ;;  %v675_v26 = vld [vmem:[#allocation3 + $0x10] sm:$0xff] }
  0x55   : > { %v303_v12 = vld [vmem:[#allocation2 + $0x20] sm:$0xff]  ;;  %v680_v27 = vld [vmem:[%s1139_s23 + $0x18] sm:$0xff]  ;;  %v679_v29 = vld [vmem:[%s1139_s23 + $0x10] sm:$0xff] }
  0x56   : > { %v304_v8 = vld [vmem:[#allocation2 + $0x28] sm:$0xff]  ;;  %v308_v13 = vpack.c.bf16 %v303_v12, %v302_v10  ;;  %v676_v28 = vld [vmem:[#allocation3 + $0x18] sm:$0xff]  ;;  %v677_v31 = vld [vmem:[%s1139_s23] sm:$0xff] }
  0x57   : > { %v305_v9 = vld [vmem:[#allocation2 + $0x38] sm:$0xff]  ;;  %v678_v30 = vld [vmem:[%s1139_s23 + $0x8] sm:$0xff]  ;;  %v775_v44 = vld [vmem:[%s1145_s5] ss:$0 sm:$0xff] }
  0x58   : > { %v309_v11 = vpack.c.bf16 %v305_v9, %v304_v8  ;;  %445 = vmatpush.bf16.msra.mxu1 %v683_v23  ;;  %690 = vmatpush.bf16.msra.mxu2 %v683_v23 }
  0x5a   : > { %347 = vmatpush.bf16.msra.mxu0 %v309_v11  ;;  %685 = vmatpush.bf16.msra.mxu3 %v309_v11 }
  0x5c   : > { %446 = vmatpush.bf16.msra.mxu1 %v682_v24  ;;  %691 = vmatpush.bf16.msra.mxu2 %v682_v24 }
  0x5e   : > { %348 = vmatpush.bf16.msra.mxu0 %v308_v13  ;;  %686 = vmatpush.bf16.msra.mxu3 %v308_v13 }
  0x60   : > { %447 = vmatpush.bf16.msra.mxu1 %v681_v25  ;;  %692 = vmatpush.bf16.msra.mxu2 %v681_v25 }
  0x62   : > { %349 = vmatpush.bf16.msra.mxu0 %v307_v16  ;;  %687 = vmatpush.bf16.msra.mxu3 %v307_v16 }
  0x64   : > { %448 = vmatpush.bf16.msra.mxu1 %v680_v27  ;;  %693 = vmatpush.bf16.msra.mxu2 %v680_v27 }
  0x66   : > { %350 = vmatpush.bf16.msra.mxu0 %v306_v19  ;;  %688 = vmatpush.bf16.msra.mxu3 %v306_v19 }
  0x68   : > { %449 = vmatpush.bf16.msra.mxu1 %v679_v29  ;;  %694 = vmatpush.bf16.msra.mxu2 %v679_v29 }
  0x69   : > { %630 = vmatmul.msk.bf16.vlgmr.msra.gmra.mxu0 %vm330_vm0, %v673_v20  ;;  %631 = vmatmul.msk.bf16.vlgmr.msra.gmra.mxu3 %vm330_vm0, %v674_v21 }
  0x6c   : > { %450 = vmatpush.bf16.msra.mxu1 %v678_v30  ;;  %695 = vmatpush.bf16.msra.mxu2 %v678_v30 }
  0x70   : > { %451 = vmatpush.bf16.msra.mxu1 %v677_v31  ;;  %696 = vmatpush.bf16.msra.mxu2 %v677_v31 }
  0x79   : > { %632 = vmatmul.msk.bf16.gmra.mxu3 %vm330_vm0, %v675_v26 }
  0x89   : > { %633 = vmatmul.msk.bf16.gmra.mxu3 %vm330_vm0, %v676_v28 }
  0xe6   : > { %v352_v32 = vpop.f32.mrf.mxu0 }
  0xec   : > { %v357_v33 = vpop.f32.mrf.mxu3 }
  0xee   : > { %v354_v34 = vpop.f32.mrf.mxu0 }
  0xef   : > { %v372_v35 = vpack.c.bf16 %v354_v34, %v352_v32 }
  0xf1   : > { %452 = vmatmul.bf16.vlgmr.msra.gmra.mxu1 %v372_v35 }
  0xf4   : > { %v359_v36 = vpop.f32.mrf.mxu3 }
  0xf5   : > { %v373_v38 = vpack.c.bf16 %v359_v36, %v357_v33 }
  0xfc   : > { %v362_v37 = vpop.f32.mrf.mxu3 }
 0x101   : > { %457 = vmatmul.bf16.gmra.mxu1 %v373_v38 }
 0x104   : > { %v364_v39 = vpop.f32.mrf.mxu3 }
 0x105   : > { %v374_v40 = vpack.c.bf16 %v364_v39, %v362_v37 }
 0x107   : > { %462 = vmatmul.bf16.vlgmr.msra.gmra.mxu2 %v374_v40 }
 0x10c   : > { %v367_v41 = vpop.f32.mrf.mxu3 }
 0x114   : > { %v369_v42 = vpop.f32.mrf.mxu3 }
 0x115   : > { %v375_v43 = vpack.c.bf16 %v369_v42, %v367_v41 }
 0x117   : > { %467 = vmatmul.bf16.gmra.mxu2 %v375_v43 }
 0x16e   : > { %v453_v45 = vpop.f32.mrf.mxu1 }
 0x16f   : > { %v454_v46 = vadd.f32 %v775_v44, %v453_v45 }
 0x176   : > { %v455_v47 = vpop.f32.mrf.mxu1 }
 0x177   : > { %v456_v48 = vadd.f32 %v775_v44, %v455_v47 }
 0x17e   : > { %v458_v49 = vpop.f32.mrf.mxu1 }
 0x17f   : > { %v459_v50 = vadd.f32 %v775_v44, %v458_v49 }
 0x186   : > { %v460_v51 = vpop.f32.mrf.mxu1 }
 0x187   : > { %v461_v52 = vadd.f32 %v775_v44, %v460_v51 }
 0x18a   : > { %v463_v53 = vpop.f32.mrf.mxu2 }
 0x18b   : > { %v464_v54 = vadd.f32 %v775_v44, %v463_v53 }
 0x192   : > { %v465_v55 = vpop.f32.mrf.mxu2 }
 0x193   : > { %v466_v56 = vadd.f32 %v775_v44, %v465_v55 }
 0x19a   : > { %v468_v57 = vpop.f32.mrf.mxu2 }
 0x19b   : > { %v469_v58 = vadd.f32 %v775_v44, %v468_v57 }
 0x19f   : > { %476 = sbr.rel (%p666_p1) target bundleno = 430 (0x1ae), region = 60 }
 0x1a2   : > { %v470_v59 = vpop.f32.mrf.mxu2 }
 0x1a3   : > { %v471_v60 = vadd.f32 %v775_v44, %v470_v59 }
 0x1a4   : > { %v477_v61 = vmax.f32 %v454_v46, 0.0  ;;  %v478_v62 = vmax.f32 %v456_v48, 0.0  ;;  %v479_v63 = vmax.f32 %v459_v50, 0.0  ;;  %v480_v0 = vmax.f32 %v461_v52, 0.0 }
 0x1a5   : > { %v481_v1 = vmax.f32 %v464_v54, 0.0  ;;  %v482_v2 = vmax.f32 %v466_v56, 0.0  ;;  %v483_v3 = vmax.f32 %v469_v58, 0.0  ;;  %v484_v4 = vmax.f32 %v471_v60, 0.0 }
 0x1a6   : > { %485 = vst [vmem:[#allocation2 + $0x30] sm:$0xff] %v477_v61 }
 0x1a7   : > { %486 = vst [vmem:[#allocation2] sm:$0xff] %v478_v62 }
 0x1a8   : > { %487 = vst [vmem:[#allocation2 + $0x18] sm:$0xff] %v479_v63 }
 0x1a9   : > { %488 = vst [vmem:[#allocation2 + $0x10] sm:$0xff] %v480_v0 }
 0x1aa   : > { %489 = vst [vmem:[#allocation2 + $0x8] sm:$0xff] %v481_v1 }
 0x1ab   : > { %490 = vst [vmem:[#allocation2 + $0x20] sm:$0xff] %v482_v2 }
 0x1ac   : > { %491 = vst [vmem:[#allocation2 + $0x28] sm:$0xff] %v483_v3 }
 0x1ad   : > { %492 = vst [vmem:[#allocation2 + $0x38] sm:$0xff] %v484_v4 }
 0x1ae PF: > { %p667_p4 = scmp.ne.s32.totalorder %s1025_s19, 2 }
 0x1b0   : > { %496 = sbr.rel (%p667_p4) target bundleno = 445 (0x1bd), region = 64 }
 0x1b5   : > { %497 = vst [vmem:[#allocation10] sm:$0xff] %v454_v46 }
 0x1b6   : > { %498 = vst [vmem:[#allocation10 + $0x8] sm:$0xff] %v456_v48 }
 0x1b7   : > { %499 = vst [vmem:[#allocation10 + $0x10] sm:$0xff] %v459_v50 }
 0x1b8   : > { %500 = vst [vmem:[#allocation10 + $0x18] sm:$0xff] %v461_v52 }
 0x1b9   : > { %501 = vst [vmem:[#allocation10 + $0x20] sm:$0xff] %v464_v54 }
 0x1ba   : > { %502 = vst [vmem:[#allocation10 + $0x28] sm:$0xff] %v466_v56 }
 0x1bb   : > { %503 = vst [vmem:[#allocation10 + $0x30] sm:$0xff] %v469_v58 }
 0x1bc   : > { %504 = vst [vmem:[#allocation10 + $0x38] sm:$0xff] %v471_v60 }
 0x1bd PF: > { %s512_s11 = sshll.u32 %s1192_s4, 4  ;;  %s978_s8 = smov [#allocation10]   ;;  %s513_s11 = int_to_ptr.hbm [resolvable:$true] %s512_s11 }
 0x1be   : > { %s510_s6 = sshll.u32 %s978_s8, 4  ;;  %s979_s9 = smov 128   ;;  %s511_s6 = int_to_ptr.vmem [resolvable:$true] %s510_s6 }
 0x1bf   : > { %s980_s10 = smov 8  }
 0x1c0   : > { %710 = dma.vmem_to_hbm [thread:$0]  (%p666_p1), %s511_s6, 1024, %s513_s11, [#allocation5], %s979_s9, %s979_s9, %s980_s10  }
 0x1c1   : > { %953 = dma.done.wait (%p666_p1), [#allocation5], 1024  }
 0x1c2   : > { %955 = vsyncadd (%p666_p1), [#allocation5], 4294966272 }
 0x1c3 PF: > { %p14_p5 = scmp.ge.s32.totalorder %s1054_s28, 5   ;;  %s1203_s15 = smov %s962_s16 }
 0x1c4   : > { %s1204_s16 = smov %s966_s17  ;;  %s1205_s17 = smov %s1069_s7 }
 0x1c5   : > { %s1206_s18 = smov %s1054_s28  ;;  %16 = sbr.rel (!%p14_p5) target bundleno = 7 (0x7), region = 103 }
 0x1ca   :  { %529 = vsyncpa [#allocation4], 1 }
 0x1cb   :  { %531 = vsyncpa [#allocation4 + $0x1], 1 }
 0x1cc   :  { %532 = vsyncpa [#allocation7], 1 }
 0x1cd   :  { %533 = vsyncpa [#allocation5], 1 }
 0x1ce   :  { %535 = vsyncpa [#allocation5 + $0x1], 1 }

</bundles_post_ra>
